<compile_context>
chip_gen: v7x
topology: tpu7x:2x2x1
jax: 0.10.0
libtpu: 0.0.40
codegen_flags: <defaults>
</compile_context>

<pallas_src>
import functools

import jax
import jax.numpy as jnp
from jax.experimental import pallas as pl
from jax.experimental.pallas import tpu as pltpu

LANES = 128
ROW_ALIGN = 32           # keeps (sublane, lane) tiling valid for f32 / bf16 / int8
MAX_BLOCK_ROWS = 4096    # 4096 x 128 x 4B = 2 MiB per operand block (tunable)
NUM_PARTIALS = 2         # independent partial sums -> both TensorCores on v7x


def _round_up(v, m):
    return ((v + m - 1) // m) * m


def _ssd_kernel(x_ref, y_ref, o_ref, acc_ref):
    """Per-partial sum of squared differences, accumulated elementwise in VMEM."""
    i = pl.program_id(1)

    @pl.when(i == 0)
    def _():
        acc_ref[...] = jnp.zeros_like(acc_ref)

    d = x_ref[...].astype(jnp.float32) - y_ref[...].astype(jnp.float32)
    acc_ref[...] += d * d  # pure VPU elementwise; fully hidden under the DMA stream

    @pl.when(i == pl.num_programs(1) - 1)
    def _():
        # Single sublane reduce per partial; lane-dense (1, 128) output row.
        o_ref[0] = jnp.sum(acc_ref[...], axis=0, keepdims=True)


@functools.partial(
    jax.jit, static_argnames=("block_rows", "blocks_per_partial", "num_partials")
)
def _ssd_pallas(x2d, y2d, *, block_rows, blocks_per_partial, num_partials):
    in_map = lambda c, i: (c * blocks_per_partial + i, 0)
    return pl.pallas_call(
        _ssd_kernel,
        out_shape=jax.ShapeDtypeStruct((num_partials, 1, LANES), jnp.float32),
        grid_spec=pltpu.PrefetchScalarGridSpec(
            num_scalar_prefetch=0,
            grid=(num_partials, blocks_per_partial),
            in_specs=[
                pl.BlockSpec((block_rows, LANES), in_map),
                pl.BlockSpec((block_rows, LANES), in_map),
            ],
            out_specs=pl.BlockSpec((1, 1, LANES), lambda c, i: (c, 0, 0)),
            scratch_shapes=[pltpu.VMEM((block_rows, LANES), jnp.float32)],
        ),
        compiler_params=pltpu.CompilerParams(
            dimension_semantics=("parallel", "arbitrary"),
        ),
    )(x2d, y2d)


def _scale_sum_sq_diff(x, y, *, max_block_rows=MAX_BLOCK_ROWS):
    """sum((x - y)^2) over all elements of one scale, computed by the Pallas kernel."""
    n = x.size
    rows = pl.cdiv(n, LANES)
    block_rows = min(int(max_block_rows), _round_up(rows, ROW_ALIGN))
    block_rows = _round_up(block_rows, ROW_ALIGN)
    num_blocks = pl.cdiv(rows, block_rows)
    blocks_per_partial = pl.cdiv(num_blocks, NUM_PARTIALS)
    padded_rows = NUM_PARTIALS * blocks_per_partial * block_rows
    padded = padded_rows * LANES

    xf = jnp.reshape(x, (-1,))
    yf = jnp.reshape(y, (-1,))
    if padded != n:
        # zero padding in both x and y -> diff is 0 -> no contribution
        xf = jnp.pad(xf, (0, padded - n))
        yf = jnp.pad(yf, (0, padded - n))
    x2d = xf.reshape(padded_rows, LANES)
    y2d = yf.reshape(padded_rows, LANES)

    partials = _ssd_pallas(
        x2d,
        y2d,
        block_rows=block_rows,
        blocks_per_partial=blocks_per_partial,
        num_partials=NUM_PARTIALS,
    )
    return jnp.sum(partials, dtype=jnp.float32)


def multiple_output_loss(xs, ys, weight_factors=None, *, max_block_rows=MAX_BLOCK_ROWS):
    """Pallas implementation of MultipleOutputLoss.forward with an MSE inner loss."""
    assert isinstance(xs, (tuple, list)), "x must be either tuple or list"
    assert isinstance(ys, (tuple, list)), "y must be either tuple or list"
    assert len(xs) == len(ys), "x and y must have the same number of scales"
    assert len(xs) >= 1, "need at least one output/target pair"
    if weight_factors is None:
        weights = [1.0] * len(xs)
    else:
        weights = list(weight_factors)
        assert len(weights) >= len(xs), "not enough weight factors for the outputs"

    # TODO(synk): the optional `loss_weights` forward argument of the PyTorch module
    # is forwarded verbatim to the inner loss; it has no meaning for plain MSE.

    total = None
    for i, (xi, yi) in enumerate(zip(xs, ys)):
        wi = weights[i]
        # The reference module always evaluates scale 0; it only skips zero-weighted
        # scales for i >= 1.
        if i > 0 and wi == 0:
            continue
        assert xi.shape == yi.shape
        ssd = _scale_sum_sq_diff(xi, yi, max_block_rows=max_block_rows)
        contrib = (float(wi) / float(xi.size)) * ssd
        total = contrib if total is None else total + contrib
    return total.astype(jnp.float32)


def _reference_loss(xs, ys, weight_factors):
    weights = [1.0] * len(xs) if weight_factors is None else list(weight_factors)
    total = weights[0] * jnp.mean(
        (xs[0].astype(jnp.float32) - ys[0].astype(jnp.float32)) ** 2
    )
    for i in range(1, len(xs)):
        if weights[i] != 0:
            total = total + weights[i] * jnp.mean(
                (xs[i].astype(jnp.float32) - ys[i].astype(jnp.float32)) ** 2
            )
    return total


if __name__ == "__main__":
    key = jax.random.PRNGKey(0)

    # Test 1: deep-supervision style multi-scale NCHW outputs, default block size.
    shapes = [(2, 4, 16, 16), (2, 4, 8, 8), (2, 4, 4, 4)]
    weight_factors = [1.0, 0.5, 0.25]
    xs, ys = [], []
    for s in shapes:
        key, k1, k2 = jax.random.split(key, 3)
        xs.append(jax.random.normal(k1, s, dtype=jnp.float32))
        ys.append(jax.random.normal(k2, s, dtype=jnp.float32))
    out1 = jax.block_until_ready(multiple_output_loss(xs, ys, weight_factors))
    ref1 = _reference_loss(xs, ys, weight_factors)
    assert jnp.allclose(out1, ref1, rtol=1e-5, atol=1e-5), (out1, ref1)

    # Test 2: small block size forces a multi-step reduction grid (exercises the
    # accumulator across grid iterations and padding) with default weights.
    shapes2 = [(2, 4, 64, 64), (2, 4, 32, 32)]
    xs2, ys2 = [], []
    for s in shapes2:
        key, k1, k2 = jax.random.split(key, 3)
        xs2.append(jax.random.normal(k1, s, dtype=jnp.float32))
        ys2.append(jax.random.normal(k2, s, dtype=jnp.float32))
    out2 = jax.block_until_ready(
        multiple_output_loss(xs2, ys2, None, max_block_rows=32)
    )
    ref2 = _reference_loss(xs2, ys2, None)
    assert jnp.allclose(out2, ref2, rtol=1e-5, atol=1e-5), (out2, ref2)

    print("KERNEL_OK")
</pallas_src>

<mosaic_0001>
module attributes {stable_mosaic.version = 11 : i64} {
  func.func @_ssd_kernel(%arg0: i32, %arg1: i32, %arg2: memref<32x128xf32, #tpu.memory_space<vmem>>, %arg3: memref<32x128xf32, #tpu.memory_space<vmem>>, %arg4: memref<1x1x128xf32, #tpu.memory_space<vmem>>, %arg5: memref<32x128xf32, #tpu.memory_space<vmem>>) attributes {dimension_semantics = [#tpu.dimension_semantics<parallel>, #tpu.dimension_semantics<arbitrary>], iteration_bounds = array<i64: 2, 1>, scalar_prefetch = 0 : i64, scratch_operands = 1 : i64, tpu.core_type = #tpu.core_type<tc>, window_params = [{transform_indices = @transform_0, window_bounds = array<i64: 32, 128>}, {transform_indices = @transform_1, window_bounds = array<i64: 32, 128>}, {transform_indices = @transform_2, window_bounds = array<i64: 1, 1, 128>}]} {
    %c0_i32 = arith.constant 0 : i32
    %0 = arith.cmpi eq, %arg1, %c0_i32 : i32
    %1 = arith.extui %0 : i1 to i32
    %c0_i32_0 = arith.constant 0 : i32
    %2 = arith.cmpi ne, %1, %c0_i32_0 : i32
    scf.if %2 {
      %cst = arith.constant 0.000000e+00 : f32
      %13 = vector.broadcast %cst : f32 to vector<32x128xf32>
      %c0_10 = arith.constant 0 : index
      %c0_11 = arith.constant 0 : index
      %14 = vector.load %arg5[%c0_10, %c0_11] : memref<32x128xf32, #tpu.memory_space<vmem>>, vector<32x128xf32>
      tpu.vector_store %arg5[%c0_10, %c0_11], %13 {strides = array<i32>} : memref<32x128xf32, #tpu.memory_space<vmem>>, vector<32x128xf32>,
    } else {
    }
    %c0 = arith.constant 0 : index
    %c0_1 = arith.constant 0 : index
    %3 = vector.load %arg2[%c0, %c0_1] : memref<32x128xf32, #tpu.memory_space<vmem>>, vector<32x128xf32>
    %c0_2 = arith.constant 0 : index
    %c0_3 = arith.constant 0 : index
    %4 = vector.load %arg3[%c0_2, %c0_3] : memref<32x128xf32, #tpu.memory_space<vmem>>, vector<32x128xf32>
    %5 = arith.subf %3, %4 : vector<32x128xf32>
    %c0_4 = arith.constant 0 : index
    %c0_5 = arith.constant 0 : index
    %6 = vector.load %arg5[%c0_4, %c0_5] : memref<32x128xf32, #tpu.memory_space<vmem>>, vector<32x128xf32>
    %7 = arith.mulf %5, %5 : vector<32x128xf32>
    %8 = arith.addf %6, %7 : vector<32x128xf32>
    %c0_6 = arith.constant 0 : index
    %c0_7 = arith.constant 0 : index
    %9 = vector.load %arg5[%c0_6, %c0_7] : memref<32x128xf32, #tpu.memory_space<vmem>>, vector<32x128xf32>
    tpu.vector_store %arg5[%c0_6, %c0_7], %8 {strides = array<i32>} : memref<32x128xf32, #tpu.memory_space<vmem>>, vector<32x128xf32>,
    %c0_i32_8 = arith.constant 0 : i32
    %10 = arith.cmpi eq, %arg1, %c0_i32_8 : i32
    %11 = arith.extui %10 : i1 to i32
    %c0_i32_9 = arith.constant 0 : i32
    %12 = arith.cmpi ne, %11, %c0_i32_9 : i32
    scf.if %12 {
      %c0_10 = arith.constant 0 : index
      %c0_11 = arith.constant 0 : index
      %13 = vector.load %arg5[%c0_10, %c0_11] : memref<32x128xf32, #tpu.memory_space<vmem>>, vector<32x128xf32>
      %cst = arith.constant dense<0.000000e+00> : vector<128xf32>
      %14 = vector.multi_reduction <add>, %13, %cst [0] : vector<32x128xf32> to vector<128xf32>
      %15 = vector.shape_cast %14 : vector<128xf32> to vector<1x128xf32>
      %c0_12 = arith.constant 0 : index
      %c0_13 = arith.constant 0 : index
      %c0_14 = arith.constant 0 : index
      %16 = vector.load %arg4[%c0_12, %c0_13, %c0_14] : memref<1x1x128xf32, #tpu.memory_space<vmem>>, vector<1x1x128xf32>
      %17 = vector.shape_cast %16 : vector<1x1x128xf32> to vector<1x128xf32>
      %18 = vector.shape_cast %15 : vector<1x128xf32> to vector<1x1x128xf32>
      tpu.vector_store %arg4[%c0_12, %c0_13, %c0_14], %18 {strides = array<i32>} : memref<1x1x128xf32, #tpu.memory_space<vmem>>, vector<1x1x128xf32>,
    } else {
    }
    return
  }
  func.func @transform_0(%arg0: i32, %arg1: i32) -> (i32, i32) {
    %c1_i32 = arith.constant 1 : i32
    %0 = arith.muli %arg0, %c1_i32 : i32
    %1 = arith.addi %0, %arg1 : i32
    %c0_i32 = arith.constant 0 : i32
    %c0_i32_0 = arith.constant 0 : i32
    return %1, %c0_i32 : i32, i32
  }
  func.func @transform_1(%arg0: i32, %arg1: i32) -> (i32, i32) {
    %c1_i32 = arith.constant 1 : i32
    %0 = arith.muli %arg0, %c1_i32 : i32
    %1 = arith.addi %0, %arg1 : i32
    %c0_i32 = arith.constant 0 : i32
    %c0_i32_0 = arith.constant 0 : i32
    return %1, %c0_i32 : i32, i32
  }
  func.func @transform_2(%arg0: i32, %arg1: i32) -> (i32, i32, i32) {
    %c0_i32 = arith.constant 0 : i32
    %c0_i32_0 = arith.constant 0 : i32
    %c0_i32_1 = arith.constant 0 : i32
    return %arg0, %c0_i32, %c0_i32_0 : i32, i32, i32
  }
}

</mosaic_0001>

<bundles_post_ra>
// kernel: _ssd_pallas.1
= control target key start
LH: loop header
LB: loop body
LE: loop exit
PB: predicated region body
PF: predicated region fallthrough
CT: control target
= control target key end

     0   :  { %7 = vsyncpa [#allocation4], 0  ;;  %s878_s0 = inlined_call_operand.hbm [shape: f32[64,128], index: 0, kind: input, shape index: {}]   ;;  %s879_s1 = inlined_call_operand.hbm [shape: f32[64,128], index: 1, kind: input, shape index: {}]   ;;  %s880_s2 = inlined_call_operand.hbm [shape: f32[2,1,128], index: 2, kind: output, shape index: {}]  }
   0x1   :  { %9 = vsyncpa [#allocation4 + $0x1], 0 }
   0x2   :  { %10 = vsyncpa [#allocation7], 0 }
   0x3   :  { %12 = vsyncpa [#allocation7 + $0x1], 0 }
   0x4   :  { %13 = vsyncpa [#allocation5], 0 }
   0x5   :  { %15 = vsyncpa [#allocation5 + $0x1], 0  ;;  %s643_s9 = smov 0   ;;  %s645_s10 = smov 0  }
   0x6   :  { %s647_s11 = smov 0   ;;  %s649_s12 = smov 0  }
   0x7   :  { %s651_s13 = smov 0   ;;  %s653_s14 = smov 0  }
   0x8 LB: > { %s388_s15 = sadd.s32 4294967295, %s621_s14   ;;  %s389_s16 = sadd.s32 4294967294, %s621_s14   ;;  %s621_s14 = sphi %s653_s14, %s21_s14   ;;  %s617_s13 = sphi %s651_s13, %s898_s13   ;;  %s613_s12 = sphi %s649_s12, %s897_s12   ;;  %s609_s11 = sphi %s647_s11, %s896_s11   ;;  %s605_s10 = sphi %s645_s10, %s895_s10   ;;  %s601_s9 = sphi %s643_s9, %s894_s9  }
   0x9   : > { %s33_s17 = sadd.s32 1, %s617_s13  ;;  %s42_s18 = sadd.s32 1, %s609_s11 }
   0xa   : > { %p35_p0 = scmp.ge.s32.totalorder %s33_s17, 2  ;;  %p49_p1 = scmp.ne.s32.totalorder %s609_s11, %s605_s10 }
   0xb   : > { %p50_p2 = scmp.eq.s32.totalorder %s621_s14, 0  ;;  %p55_p3 = scmp.ne.s32.totalorder %s605_s10, %s601_s9 }
   0xc   : > { %s900_s17 = smov (%p35_p0, %s33_s17), 0  ;;  %p56_p5 = scmp.eq.s32.totalorder %s388_s15, 0 }
   0xd   : > { %p684_p4 = por %p50_p2, %p49_p1  ;;  %s39_s20 = ssub.s32 %s617_s13, %s900_s17 }
   0xe   : > { %p107_p6 = scmp.eq.s32.totalorder %s388_s15, 1  ;;  %p40_p7 = scmp.eq.s32.totalorder %s39_s20, 0 }
   0xf   : > { %p690_p8 = por %p56_p5, %p55_p3  ;;  %p113_p10 = scmp.eq.s32.totalorder %s389_s16, 1 }
  0x10   : > { %p694_p9 = por %p107_p6, %p49_p1  ;;  %p423_p13 = scmp.lt.s32.totalorder %s621_s14, 2 }
  0x11   : > { %s884_s21 = scalar_select %p690_p8, 1, 0 }
  0x12   : > { %s885_s22 = scalar_select %p694_p9, 1, 0 }
  0x13   : > { %s699_s23 = scalar_select %p40_p7, %s609_s11, %s42_s18  }
  0x14   : > { %p701_p11 = por %p113_p10, %p55_p3  ;;  %s708_s25 = sand.u32 1, %s609_s11  }
  0x15   : > { %s392_s26 = sshll.u32 %s708_s25, 5  ;;  %s404_s27 = sshll.u32 %s617_s13, 9 }
  0x16   : > { %s886_s24 = scalar_select %p701_p11, 1, 0 }
  0x17   : > { %s717_s30 = scalar_lea.hbm %s878_s0, %s404_s27  ;;  %s137_s3 = scalar_lea.vmem [#allocation3], %s392_s26 }
  0x18   : > { %s145_s4 = sshll.u32 %s137_s3, 4  ;;  %p725_p0 = pnand %p423_p13, %p684_p4  ;;  %s721_s4 = int_to_ptr.vmem [resolvable:$true] %s145_s4 }
  0x19   : > { %s134_s6 = scalar_lea.sflag [#allocation4], %s708_s25  ;;  %s475_s7 = scalar_lea.hbm %s717_s30, 512 }
  0x1a   : > { %p476_p2 = scmp.ne.s32.totalorder %s717_s30, %s475_s7  ;;  %p477_p3 = pneg %p725_p0 }
  0x1b   : > { %s480_s16 = scalar_lea.hbm %s878_s0, 1024  ;;  %p481_p4 = scmp.lt.u32.totalorder %s717_s30, %s878_s0 }
  0x1c   : > { %p478_p5 = pnand %p477_p3, %p476_p2  ;;  %p482_p7 = scmp.lt.u32.totalorder %s480_s16, %s475_s7 }
  0x1d   : > { %p484_p13 = scmp.lt.u32.totalorder %s475_s7, %s717_s30 }
  0x1e   : > { %p479_p6 = pneg %p478_p5  ;;  %p483_p10 = por %p482_p7, %p481_p4 }
  0x20   : > { %p485_p12 = por %p484_p13, %p483_p10 }
  0x22   : > { %p486_p1 = pnand %p485_p12, %p479_p6 }
  0x24   : > { %489 = shalt.err (!%p486_p1)
}
  0x25   : > { %s490_s20 = scalar_lea.vmem %s721_s4, 512  ;;  %s623_s28 = smov [#allocation3]  }
  0x26   : > { %p491_p2 = scmp.ne.s32.totalorder %s721_s4, %s490_s20  ;;  %s495_s29 = sshll.u32 %s623_s28, 4  ;;  %s496_s29 = int_to_ptr.vmem [resolvable:$false] %s495_s29 }
  0x27   : > { %s497_s3 = scalar_lea.vmem %s496_s29, 1024  ;;  %p498_p9 = scmp.lt.s32.totalorder %s721_s4, %s496_s29 }
  0x28   : > { %p493_p5 = pnand %p491_p2, %p477_p3  ;;  %p499_p4 = scmp.lt.s32.totalorder %s497_s3, %s490_s20 }
  0x2a   : > { %p494_p11 = pneg %p493_p5  ;;  %p500_p7 = por %p499_p4, %p498_p9 }
  0x2c   : > { %p501_p10 = pnand %p500_p7, %p494_p11 }
  0x2e   : > { %504 = shalt.err (!%p501_p10)
}
  0x2f   : > { %s624_s7 = smov 128   ;;  %s625_s8 = smov 8  }
  0x30   : > { %415 = dma.hbm_to_vmem [thread:$0]  (!%p725_p0), %s717_s30, 512, %s721_s4, %s134_s6, %s624_s7, %s624_s7, %s625_s8  }
  0x31   : > { %p175_p9 = scmp.lt.s32.totalorder %s621_s14, 3  ;;  %s767_s18 = scalar_lea.hbm %s879_s1, %s404_s27 }
  0x32   : > { %p888_p11 = scmp.ge.s32.totalorder %s621_s14, 1  ;;  %s159_s20 = scalar_lea.vmem [#allocation6], %s392_s26 }
  0x33   : > { %s167_s28 = sshll.u32 %s159_s20, 4  ;;  %s156_s30 = scalar_lea.sflag [#allocation7], %s708_s25  ;;  %s777_s28 = int_to_ptr.vmem [resolvable:$true] %s167_s28 }
  0x34   : > { %p771_p12 = pnand %p888_p11, %p175_p9  ;;  %s505_s4 = scalar_lea.hbm %s767_s18, 512 }
  0x35   : > { %p506_p1 = scmp.ne.s32.totalorder %s767_s18, %s505_s4  ;;  %s510_s29 = scalar_lea.hbm %s879_s1, 1024 }
  0x36   : > { %p511_p2 = scmp.lt.u32.totalorder %s767_s18, %s879_s1  ;;  %p512_p5 = scmp.lt.u32.totalorder %s510_s29, %s505_s4 }
  0x37   : > { %p508_p6 = pnand %p506_p1, %p477_p3  ;;  %p514_p7 = scmp.lt.u32.totalorder %s505_s4, %s767_s18 }
  0x38   : > { %p513_p4 = por %p512_p5, %p511_p2 }
  0x39   : > { %p509_p13 = pneg %p508_p6 }
  0x3a   : > { %p515_p10 = por %p514_p7, %p513_p4 }
  0x3c   : > { %p516_p9 = pnand %p515_p10, %p509_p13 }
  0x3e   : > { %519 = shalt.err (!%p516_p9)
}
  0x3f   : > { %s520_s26 = scalar_lea.vmem %s777_s28, 512  ;;  %s626_s16 = smov [#allocation6]  }
  0x40   : > { %p521_p11 = scmp.ne.s32.totalorder %s777_s28, %s520_s26  ;;  %s525_s20 = sshll.u32 %s626_s16, 4  ;;  %s526_s20 = int_to_ptr.vmem [resolvable:$false] %s525_s20 }
  0x41   : > { %s527_s27 = scalar_lea.vmem %s526_s20, 1024  ;;  %p528_p8 = scmp.lt.s32.totalorder %s777_s28, %s526_s20 }
  0x42   : > { %p523_p1 = pnand %p521_p11, %p477_p3  ;;  %p529_p2 = scmp.lt.s32.totalorder %s527_s27, %s520_s26 }
  0x44   : > { %p524_p6 = pneg %p523_p1  ;;  %p530_p5 = por %p529_p2, %p528_p8 }
  0x46   : > { %p531_p4 = pnand %p530_p5, %p524_p6 }
  0x48   : > { %534 = shalt.err (!%p531_p4)
}
  0x49   : > { %418 = dma.hbm_to_vmem [thread:$0]  (!%p725_p0), %s767_s18, 512, %s777_s28, %s156_s30, %s624_s7, %s624_s7, %s625_s8  }
  0x4a   : > { %179 = sbr.rel (%p771_p12) target bundleno = 123 (0x7b), region = 28  ;;  %s811_s4 = sand.u32 (!%p771_p12), 1, %s605_s10  }
  0x4b   : > { %s399_s6 = sshll.u32 (!%p771_p12), %s811_s4, 5  ;;  %s182_s29 = scalar_lea.sflag (!%p771_p12), [#allocation4], %s811_s4 }
  0x4c   : > { %s185_s5 = scalar_lea.vmem (!%p771_p12), [#allocation3], %s399_s6  ;;  %p890_p8 = scmp.ne.s32.totalorder (!%p771_p12), %s884_s21, 0 }
  0x51   : > { %588 = dma.done.wait (%p890_p8), %s182_s29, 512  }
  0x52   : > { %590 = vsyncadd (%p890_p8), %s182_s29, 4294966784  ;;  %s191_s25 = scalar_lea.sflag [#allocation7], %s811_s4  ;;  %s194_s7 = scalar_lea.vmem [#allocation6], %s399_s6 }
  0x53   : > { %592 = dma.done.wait (%p890_p8), %s191_s25, 512  }
  0x54   : > { %594 = vsyncadd (%p890_p8), %s191_s25, 4294966784  ;;  %v231_v0 = vld [vmem:[%s185_s5] sm:$0xff]  ;;  %v232_v1 = vld [vmem:[%s185_s5 + $0x8] sm:$0xff]  ;;  %s218_s21 = scalar_lea.vmem [#allocation8], %s811_s4  ;;  %s401_s18 = sshll.u32 %s613_s12, 4 }
  0x55   : > { %v233_v2 = vld [vmem:[%s185_s5 + $0x10] sm:$0xff]  ;;  %v234_v3 = vld [vmem:[%s185_s5 + $0x18] sm:$0xff]  ;;  %v235_v4 = vld [vmem:[%s194_s7] sm:$0xff]  ;;  %s289_s8 = sshll.u32 %s218_s21, 4  ;;  %s831_s30 = scalar_lea.hbm %s880_s2, %s401_s18  ;;  %s826_s8 = int_to_ptr.vmem [resolvable:$true] %s289_s8 }
  0x56   : > { %v236_v5 = vld [vmem:[%s194_s7 + $0x8] sm:$0xff]  ;;  %v237_v6 = vld [vmem:[%s194_s7 + $0x10] sm:$0xff]  ;;  %v238_v7 = vld [vmem:[%s194_s7 + $0x18] sm:$0xff]  ;;  %v239_v8 = vsub.f32 %v231_v0, %v235_v4  ;;  %s277_s3 = scalar_lea.sflag [#allocation5], %s811_s4  ;;  %s535_s15 = scalar_lea.vmem %s826_s8, 16 }
  0x57   : > { %v240_v9 = vsub.f32 %v232_v1, %v236_v5  ;;  %v241_v10 = vsub.f32 %v233_v2, %v237_v6  ;;  %v242_v11 = vsub.f32 %v234_v3, %v238_v7  ;;  %p536_p0 = scmp.ne.s32.totalorder %s826_s8, %s535_s15  ;;  %p891_p3 = scmp.ne.s32.totalorder %s885_s22, 0 }
  0x58   : > { %v247_v12 = vmul.f32 %v239_v8, %v239_v8  ;;  %s627_s12 = smov [#allocation8]  }
  0x59   : > { %v248_v13 = vmul.f32 %v240_v9, %v240_v9  ;;  %v249_v14 = vmul.f32 %v241_v10, %v241_v10  ;;  %v250_v15 = vmul.f32 %v242_v11, %v242_v11  ;;  %p537_p12 = pnand %p536_p0, %p891_p3  ;;  %s539_s26 = sshll.u32 %s627_s12, 4  ;;  %s540_s26 = int_to_ptr.vmem [resolvable:$false] %s539_s26 }
  0x5a   : > { %s541_s16 = scalar_lea.vmem %s540_s26, 32  ;;  %p542_p7 = scmp.lt.s32.totalorder %s826_s8, %s540_s26 }
  0x5b   : > { %v266_v16 = vadd.f32 %v248_v13, %v247_v12  ;;  %p538_p13 = pneg %p537_p12  ;;  %p543_p10 = scmp.lt.s32.totalorder %s541_s16, %s535_s15 }
  0x5d   : > { %v267_v17 = vadd.f32 %v266_v16, %v249_v14  ;;  %p544_p9 = por %p543_p10, %p542_p7 }
  0x5f   : > { %v268_v18 = vadd.f32 %v267_v17, %v250_v15  ;;  %p545_p11 = pnand %p544_p9, %p538_p13 }
  0x61   : > { %v269_v19 = vrot.slane %v268_v18, 4 }
  0x63   : > { %v270_v20 = vadd.f32 %v269_v19, %v268_v18 }
  0x65   : > { %v271_v21 = vrot.slane %v270_v20, 2 }
  0x67   : > { %v272_v22 = vadd.f32 %v271_v21, %v270_v20 }
  0x69   : > { %v273_v23 = vrot.slane %v272_v22, 1 }
  0x6b   : > { %v274_v24 = vadd.f32 %v273_v23, %v272_v22 }
  0x6d   : > { %275 = vst [vmem:[%s218_s21] sm:$0x1] %v274_v24 }
  0x6e   : > { %548 = shalt.err (!%p545_p11)
}
  0x6f   : > { %s549_s20 = scalar_lea.hbm %s831_s30, 16  ;;  %s553_s6 = scalar_lea.hbm %s880_s2, 32 }
  0x70   : > { %p550_p1 = scmp.ne.s32.totalorder %s831_s30, %s549_s20  ;;  %p554_p5 = scmp.lt.u32.totalorder %s831_s30, %s880_s2 }
  0x71   : > { %p555_p4 = scmp.lt.u32.totalorder %s553_s6, %s549_s20  ;;  %p557_p0 = scmp.lt.u32.totalorder %s549_s20, %s831_s30 }
  0x72   : > { %p551_p6 = pnand %p550_p1, %p891_p3 }
  0x73   : > { %p556_p8 = por %p555_p4, %p554_p5 }
  0x74   : > { %p552_p2 = pneg %p551_p6 }
  0x75   : > { %p558_p12 = por %p557_p0, %p556_p8 }
  0x77   : > { %p559_p13 = pnand %p558_p12, %p552_p2 }
  0x79   : > { %562 = shalt.err (!%p559_p13)
}
  0x7a   : > { %410 = dma.vmem_to_hbm [thread:$0]  (%p891_p3), %s826_s8, 16, %s831_s30, %s277_s3  }
  0x7b PF: > { %s301_s25 = sand.u32 1, %s601_s9   ;;  %p892_p7 = scmp.ne.s32.totalorder %s886_s24, 0 }
  0x7c   : > { %p893_p10 = scmp.ge.s32.totalorder %s621_s14, 2  ;;  %s302_s7 = scalar_lea.sflag [#allocation5], %s301_s25 }
  0x7e   : > { %p420_p9 = pnand %p893_p10, %p892_p7 }
  0x80   : > { %596 = dma.done.wait (!%p420_p9), %s302_s7, 16  }
  0x81   : > { %598 = vsyncadd (!%p420_p9), %s302_s7, 4294967280  ;;  %s21_s14 = sadd.s32 1, %s621_s14   ;;  %s894_s9 = smov %s605_s10 }
  0x82   : > { %p18_p11 = scmp.ge.s32.totalorder %s21_s14, 4   ;;  %s895_s10 = smov %s609_s11 }
  0x83   : > { %s896_s11 = smov %s699_s23  ;;  %s897_s12 = smov %s617_s13 }
  0x84   : > { %s898_s13 = smov %s900_s17  ;;  %20 = sbr.rel (!%p18_p11) target bundleno = 8 (0x8), region = 94 }
  0x8b   :  { %306 = vsyncpa [#allocation4], 1 }
  0x8c   :  { %308 = vsyncpa [#allocation4 + $0x1], 1 }
  0x8d   :  { %309 = vsyncpa [#allocation7], 1 }
  0x8e   :  { %311 = vsyncpa [#allocation7 + $0x1], 1 }
  0x8f   :  { %312 = vsyncpa [#allocation5], 1 }
  0x90   :  { %314 = vsyncpa [#allocation5 + $0x1], 1 }

</bundles_post_ra>
